<compile_context>
chip_gen: v6e
topology: v6e:2x2x1
jax: 0.10.0
libtpu: 0.0.40
codegen_flags: <defaults>
</compile_context>

<pallas_src>
import functools

import jax
import jax.numpy as jnp
from jax import lax
from jax.experimental import pallas as pl
from jax.experimental.pallas import tpu as pltpu


def _round_up(a, b):
    return -(-a // b) * b


# ---------------------------------------------------------------------------
# Kernel body: one (batch tile i, feature tile j) grid step.
# ---------------------------------------------------------------------------
def sae_kernel(x_ref, w_ref, benc_ref, bdec_ref, recon_ref, f_ref, *scratch,
               compute_dtype):
    """
    x_ref    : (tm, D)   input activations tile
    w_ref    : (tf, D)   encoder/decoder (tied) weight tile
    benc_ref : (1,  tf)  encoder bias tile
    bdec_ref : (1,  D)   decoder bias
    recon_ref: (tm, D)   reconstruction tile (resident across j)
    f_ref    : (tm, tf)  sparse feature output tile
    scratch  : ()        if recon dtype is f32 (accumulate into recon_ref)
               (acc,)    f32 VMEM accumulator otherwise
    """
    acc_ref = scratch[0] if scratch else recon_ref
    j = pl.program_id(1)

    @pl.when(j == 0)
    def _init():
        acc_ref[...] = jnp.zeros_like(acc_ref)

    x = x_ref[...].astype(compute_dtype)
    w = w_ref[...].astype(compute_dtype)

    # Encoder in NT form: contract the shared last (D) dim -> (tm, tf).
    # No weight transpose is materialized; MXU is fed directly.
    pre = lax.dot_general(
        x, w,
        dimension_numbers=(((1,), (1,)), ((), ())),
        preferred_element_type=jnp.float32,
    ) + benc_ref[...].astype(jnp.float32)
    f = jnp.maximum(pre, 0.0)                       # f32 bias + ReLU epilogue
    f_ref[...] = f.astype(f_ref.dtype)

    # Tied decoder: accumulate the partial f_tile @ w_tile (f32 accumulation).
    acc_ref[...] += jnp.dot(f.astype(compute_dtype), w,
                            preferred_element_type=jnp.float32)

    @pl.when(j == pl.num_programs(1) - 1)
    def _finish():
        recon_ref[...] = (
            acc_ref[...] + bdec_ref[...].astype(jnp.float32)
        ).astype(recon_ref.dtype)


# ---------------------------------------------------------------------------
# Tile selection driven by the real VMEM budget.
# ---------------------------------------------------------------------------
def _choose_tiles(B, D, F, x_sz, w_sz, out_sz, f_sz, acc_per_row, budget,
                  sublane, tm_req=None, tf_req=None):
    Bp_min = _round_up(B, sublane)
    head = 2 << 20  # bias tiles / compiler scratch headroom inside the budget

    def footprint(tm_, tf_):
        return (2 * tm_ * D * x_sz            # x tile (double buffered)
                + 2 * tf_ * D * w_sz          # weight tile
                + 2 * tm_ * D * out_sz        # recon tile
                + 2 * tm_ * tf_ * f_sz        # f tile
                + tm_ * acc_per_row           # optional f32 acc scratch
                + 2 * 8 * tf_ * 4 + 2 * 8 * D * 4   # padded bias tiles
                + head)

    Fp0 = _round_up(F, 128)
    tf_min = min(128, Fp0)

    # Batch tile = weight-reuse lever; as large as B / budget allow (<= 512).
    if tm_req is not None:
        tm_ = min(_round_up(tm_req, sublane), Bp_min)
    else:
        tm_ = _round_up(min(512, Bp_min), sublane)
        while tm_ > sublane and footprint(tm_, tf_min) > budget:
            tm_ = max(sublane, _round_up(tm_ // 2, sublane))
    tm_ = max(tm_, sublane)

    # Feature tile: powers-of-two multiples of 256 where possible.
    if tf_req is not None:
        tf_ = min(_round_up(tf_req, 128), Fp0)
    else:
        tf_ = 256 if Fp0 >= 256 else Fp0
        while tf_ * 2 <= min(Fp0, 4096) and footprint(tm_, tf_ * 2) <= budget:
            tf_ *= 2
    while tf_ > 128 and footprint(tm_, tf_) > budget:
        tf_ -= 128
    while tm_ > sublane and footprint(tm_, tf_) > budget:
        tm_ = max(sublane, _round_up(tm_ // 2, sublane))

    # Keep >= 2 batch tiles for big batches so both TCs get work on v7x.
    if tm_req is None and B >= 256 and _round_up(B, tm_) // tm_ < 2:
        tm_ = max(sublane, _round_up(_round_up(B, 2 * sublane) // 2, sublane))

    Bp = _round_up(B, tm_)
    Fp = _round_up(F, tf_)
    return tm_, tf_, Bp, Fp, footprint(tm_, tf_)


# ---------------------------------------------------------------------------
# Wrapper
# ---------------------------------------------------------------------------
def sparse_autoencoder_forward(x, w_enc, b_enc, b_dec, *,
                               tm=None, tf=None,
                               compute_dtype=None, f_dtype=None):
    """Fused SAE forward. Grid = (batch tiles [parallel], feature tiles [arbitrary])."""
    B, D = x.shape
    F, D2 = w_enc.shape
    assert D == D2, "weight input_dim must match x"

    out_dtype = x.dtype
    if compute_dtype is None:
        compute_dtype = x.dtype           # default: faithful f32 path
    if f_dtype is None:
        f_dtype = out_dtype               # optionally bf16 to halve f writeback

    # Cast the big tied weight to the MXU compute dtype in HBM (halves the
    # dominant weight-streaming traffic when compute_dtype is bf16).
    w_store = w_enc
    if jnp.dtype(compute_dtype).itemsize < jnp.dtype(w_enc.dtype).itemsize:
        w_store = w_enc.astype(compute_dtype)

    x_sz = jnp.dtype(x.dtype).itemsize
    w_sz = jnp.dtype(w_store.dtype).itemsize
    out_sz = jnp.dtype(out_dtype).itemsize
    f_sz = jnp.dtype(f_dtype).itemsize

    # Accumulate directly into recon_ref when it is f32; scratch only for
    # narrow output dtypes.
    use_scratch = jnp.dtype(out_dtype) != jnp.dtype(jnp.float32)
    acc_per_row = D * 4 if use_scratch else 0

    # Sublane granularity for blocks whose second-to-last dim is tm.
    min_item = min(x_sz, out_sz, f_sz)
    sublane = {4: 8, 2: 16, 1: 32}.get(min_item, 8)

    # Per-generation VMEM budget (v7x: 64 MiB -> ~48 MiB; v5e/v6e: 128 -> 112).
    try:
        vmem_cap = int(getattr(pltpu.get_tpu_info(), "vmem_capacity_bytes",
                               64 << 20))
    except Exception:
        vmem_cap = 64 << 20
    budget = max(vmem_cap - (16 << 20), 32 << 20)

    tm_eff, tf_eff, Bp, Fp, footprint = _choose_tiles(
        B, D, F, x_sz, w_sz, out_sz, f_sz, acc_per_row, budget, sublane,
        tm_req=tm, tf_req=tf)

    nb = Bp // tm_eff
    nf = Fp // tf_eff

    # Pad batch / feature dims (zero padding keeps the math exact: padded
    # feature rows have zero weight & bias -> zero f -> zero recon contrib).
    xp = x if Bp == B else jnp.pad(x, ((0, Bp - B), (0, 0)))
    wp = w_store if Fp == F else jnp.pad(w_store, ((0, Fp - F), (0, 0)))
    bep = b_enc if Fp == F else jnp.pad(b_enc, (0, Fp - F))
    b_enc2 = bep.reshape(1, Fp)
    b_dec2 = b_dec.reshape(1, D)

    vmem_limit = int(min(max(footprint + (4 << 20), 32 << 20), vmem_cap))

    cost = pl.CostEstimate(
        flops=4 * Bp * Fp * D,                       # two matmuls, 2 flop/MAC
        transcendentals=0,
        bytes_accessed=(Bp * D * x_sz + nb * Fp * D * w_sz
                        + Bp * Fp * f_sz + Bp * D * out_sz),
    )

    kernel = functools.partial(sae_kernel, compute_dtype=compute_dtype)
    scratch_shapes = ([pltpu.VMEM((tm_eff, D), jnp.float32)]
                      if use_scratch else [])

    recon, f = pl.pallas_call(
        kernel,
        out_shape=(
            jax.ShapeDtypeStruct((Bp, D), out_dtype),   # reconstructed_x
            jax.ShapeDtypeStruct((Bp, Fp), f_dtype),    # f (features)
        ),
        grid_spec=pltpu.PrefetchScalarGridSpec(
            num_scalar_prefetch=0,
            grid=(nb, nf),
            in_specs=[
                pl.BlockSpec((tm_eff, D), lambda i, j: (i, 0)),       # x tile
                pl.BlockSpec((tf_eff, D), lambda i, j: (j, 0)),       # W tile
                pl.BlockSpec((1, tf_eff), lambda i, j: (0, j)),       # b_enc
                pl.BlockSpec((1, D), lambda i, j: (0, 0)),            # b_dec
            ],
            out_specs=[
                pl.BlockSpec((tm_eff, D), lambda i, j: (i, 0)),       # recon (resident over j)
                pl.BlockSpec((tm_eff, tf_eff), lambda i, j: (i, j)),  # f tile
            ],
            scratch_shapes=scratch_shapes,
        ),
        compiler_params=pltpu.CompilerParams(
            dimension_semantics=("parallel", "arbitrary"),
            vmem_limit_bytes=vmem_limit,
        ),
        cost_estimate=cost,
    )(xp, wp, b_enc2, b_dec2)

    if Bp != B:
        recon = recon[:B]
        f = f[:B]
    if Fp != F:
        f = f[:, :F]
    return recon, f


def sparse_autoencoder_ref(x, w_enc, b_enc, b_dec):
    """Pure-JAX reference mirroring the PyTorch module (full-precision dots)."""
    hi = lax.Precision.HIGHEST
    f = jax.nn.relu(jnp.dot(x, w_enc.T, precision=hi) + b_enc)
    recon = jnp.dot(f, w_enc, precision=hi) + b_dec
    return recon, f


if __name__ == "__main__":
    # --- Test 1: small shapes, default f32 path ------------------------------
    B, D, F = 8, 128, 256
    key = jax.random.PRNGKey(0)
    k_x, k_w, k_b = jax.random.split(key, 3)

    x = jax.random.normal(k_x, (B, D), dtype=jnp.float32)
    bound = 1.0 / (D ** 0.5)
    w_enc = jax.random.uniform(k_w, (F, D), jnp.float32, -bound, bound)
    b_enc = jax.random.uniform(k_b, (F,), jnp.float32, -bound, bound)
    b_dec = jnp.zeros((D,), dtype=jnp.float32)

    recon, f = sparse_autoencoder_forward(x, w_enc, b_enc, b_dec)
    jax.block_until_ready((recon, f))
    recon_r, f_r = sparse_autoencoder_ref(x, w_enc, b_enc, b_dec)
    assert recon.shape == (B, D) and f.shape == (B, F)
    assert jnp.allclose(recon, recon_r, atol=2e-3, rtol=2e-3)
    assert jnp.allclose(f, f_r, atol=2e-3, rtol=2e-3)

    # --- Test 2: multi-tile grid, batch + feature padding, small tiles -------
    B2, D2, F2 = 50, 128, 200           # F2 not a multiple of 128 -> pad path
    k_x2, k_w2, k_b2 = jax.random.split(jax.random.PRNGKey(1), 3)
    x2 = jax.random.normal(k_x2, (B2, D2), dtype=jnp.float32)
    bound2 = 1.0 / (D2 ** 0.5)
    w2 = jax.random.uniform(k_w2, (F2, D2), jnp.float32, -bound2, bound2)
    be2 = jax.random.uniform(k_b2, (F2,), jnp.float32, -bound2, bound2)
    bd2 = jax.random.normal(jax.random.PRNGKey(2), (D2,), dtype=jnp.float32) * 0.01

    recon2, f2 = sparse_autoencoder_forward(x2, w2, be2, bd2, tm=16, tf=128)
    jax.block_until_ready((recon2, f2))
    recon2_r, f2_r = sparse_autoencoder_ref(x2, w2, be2, bd2)
    assert recon2.shape == (B2, D2) and f2.shape == (B2, F2)
    assert jnp.allclose(recon2, recon2_r, atol=2e-3, rtol=2e-3)
    assert jnp.allclose(f2, f2_r, atol=2e-3, rtol=2e-3)

    # --- Test 3: bf16 compute path (bf16 MXU, f32 accumulation/epilogue) -----
    recon3, f3 = sparse_autoencoder_forward(
        x, w_enc, b_enc, b_dec, compute_dtype=jnp.bfloat16)
    jax.block_until_ready((recon3, f3))
    assert jnp.allclose(recon3, recon_r, atol=5e-2, rtol=5e-2)
    assert jnp.allclose(f3, f_r, atol=5e-2, rtol=5e-2)

    # --- Test 4: bf16 inputs/outputs (exercises scratch accumulator path) ----
    xb = x.astype(jnp.bfloat16)
    wb = w_enc.astype(jnp.bfloat16)
    beb = b_enc.astype(jnp.bfloat16)
    bdb = b_dec.astype(jnp.bfloat16)
    recon4, f4 = sparse_autoencoder_forward(xb, wb, beb, bdb)
    jax.block_until_ready((recon4, f4))
    recon4_r, f4_r = sparse_autoencoder_ref(
        xb.astype(jnp.float32), wb.astype(jnp.float32),
        beb.astype(jnp.float32), bdb.astype(jnp.float32))
    assert recon4.dtype == jnp.bfloat16 and f4.dtype == jnp.bfloat16
    assert jnp.allclose(recon4.astype(jnp.float32), recon4_r, atol=1e-1, rtol=1e-1)
    assert jnp.allclose(f4.astype(jnp.float32), f4_r, atol=1e-1, rtol=1e-1)

    print("KERNEL_OK")
</pallas_src>

<mosaic_0001>
module attributes {stable_mosaic.version = 11 : i64} {
  func.func @sae_kernel(%arg0: i32, %arg1: i32, %arg2: memref<8x128xf32, #tpu.memory_space<vmem>>, %arg3: memref<256x128xf32, #tpu.memory_space<vmem>>, %arg4: memref<1x256xf32, #tpu.memory_space<vmem>>, %arg5: memref<1x128xf32, #tpu.memory_space<vmem>>, %arg6: memref<8x128xf32, #tpu.memory_space<vmem>>, %arg7: memref<8x256xf32, #tpu.memory_space<vmem>>) attributes {dimension_semantics = [#tpu.dimension_semantics<parallel>, #tpu.dimension_semantics<arbitrary>], iteration_bounds = array<i64: 1, 1>, scalar_prefetch = 0 : i64, scratch_operands = 0 : i64, tpu.core_type = #tpu.core_type<tc>, window_params = [{transform_indices = @transform_0, window_bounds = array<i64: 8, 128>}, {transform_indices = @transform_1, window_bounds = array<i64: 256, 128>}, {transform_indices = @transform_2, window_bounds = array<i64: 1, 256>}, {pipeline_mode = #tpu.pipeline_mode<synchronous>, transform_indices = @transform_3, window_bounds = array<i64: 1, 128>}, {transform_indices = @transform_4, window_bounds = array<i64: 8, 128>}, {transform_indices = @transform_5, window_bounds = array<i64: 8, 256>}]} {
    %c0_i32 = arith.constant 0 : i32
    %0 = arith.cmpi eq, %arg1, %c0_i32 : i32
    %1 = arith.extui %0 : i1 to i32
    %c0_i32_0 = arith.constant 0 : i32
    %2 = arith.cmpi ne, %1, %c0_i32_0 : i32
    scf.if %2 {
      %cst_16 = arith.constant 0.000000e+00 : f32
      %19 = vector.broadcast %cst_16 : f32 to vector<8x128xf32>
      %c0_17 = arith.constant 0 : index
      %c0_18 = arith.constant 0 : index
      %20 = vector.load %arg6[%c0_17, %c0_18] : memref<8x128xf32, #tpu.memory_space<vmem>>, vector<8x128xf32>
      tpu.vector_store %arg6[%c0_17, %c0_18], %19 {strides = array<i32>} : memref<8x128xf32, #tpu.memory_space<vmem>>, vector<8x128xf32>,
    } else {
    }
    %c0 = arith.constant 0 : index
    %c0_1 = arith.constant 0 : index
    %3 = vector.load %arg2[%c0, %c0_1] : memref<8x128xf32, #tpu.memory_space<vmem>>, vector<8x128xf32>
    %c0_2 = arith.constant 0 : index
    %c0_3 = arith.constant 0 : index
    %4 = vector.load %arg3[%c0_2, %c0_3] : memref<256x128xf32, #tpu.memory_space<vmem>>, vector<256x128xf32>
    %cst = arith.constant dense<0.000000e+00> : vector<8x256xf32>
    %5 = tpu.matmul %3, %4, %cst {dimension_numbers = #tpu.dot_dimension_numbers<[1], [1], [0], [0], [0, 0, 1, 0], [], []>} : vector<8x128xf32>, vector<256x128xf32>, vector<8x256xf32> -> vector<8x256xf32>
    %c0_4 = arith.constant 0 : index
    %c0_5 = arith.constant 0 : index
    %6 = vector.load %arg4[%c0_4, %c0_5] : memref<1x256xf32, #tpu.memory_space<vmem>>, vector<1x256xf32>
    %7 = vector.broadcast %6 : vector<1x256xf32> to vector<8x256xf32>
    %8 = arith.addf %5, %7 : vector<8x256xf32>
    %cst_6 = arith.constant 0.000000e+00 : f32
    %9 = vector.broadcast %cst_6 : f32 to vector<8x256xf32>
    %10 = arith.maximumf %8, %9 : vector<8x256xf32>
    %c0_7 = arith.constant 0 : index
    %c0_8 = arith.constant 0 : index
    %11 = vector.load %arg7[%c0_7, %c0_8] : memref<8x256xf32, #tpu.memory_space<vmem>>, vector<8x256xf32>
    tpu.vector_store %arg7[%c0_7, %c0_8], %10 {strides = array<i32>} : memref<8x256xf32, #tpu.memory_space<vmem>>, vector<8x256xf32>,
    %c0_9 = arith.constant 0 : index
    %c0_10 = arith.constant 0 : index
    %12 = vector.load %arg6[%c0_9, %c0_10] : memref<8x128xf32, #tpu.memory_space<vmem>>, vector<8x128xf32>
    %cst_11 = arith.constant dense<0.000000e+00> : vector<8x128xf32>
    %13 = tpu.matmul %10, %4, %cst_11 {dimension_numbers = #tpu.dot_dimension_numbers<[1], [0], [0], [1], [0, 0, 1, 1], [], []>} : vector<8x256xf32>, vector<256x128xf32>, vector<8x128xf32> -> vector<8x128xf32>
    %14 = arith.addf %12, %13 : vector<8x128xf32>
    %c0_12 = arith.constant 0 : index
    %c0_13 = arith.constant 0 : index
    %15 = vector.load %arg6[%c0_12, %c0_13] : memref<8x128xf32, #tpu.memory_space<vmem>>, vector<8x128xf32>
    tpu.vector_store %arg6[%c0_12, %c0_13], %14 {strides = array<i32>} : memref<8x128xf32, #tpu.memory_space<vmem>>, vector<8x128xf32>,
    %c0_i32_14 = arith.constant 0 : i32
    %16 = arith.cmpi eq, %arg1, %c0_i32_14 : i32
    %17 = arith.extui %16 : i1 to i32
    %c0_i32_15 = arith.constant 0 : i32
    %18 = arith.cmpi ne, %17, %c0_i32_15 : i32
    scf.if %18 {
      %c0_16 = arith.constant 0 : index
      %c0_17 = arith.constant 0 : index
      %19 = vector.load %arg6[%c0_16, %c0_17] : memref<8x128xf32, #tpu.memory_space<vmem>>, vector<8x128xf32>
      %c0_18 = arith.constant 0 : index
      %c0_19 = arith.constant 0 : index
      %20 = vector.load %arg5[%c0_18, %c0_19] : memref<1x128xf32, #tpu.memory_space<vmem>>, vector<1x128xf32>
      %21 = vector.broadcast %20 : vector<1x128xf32> to vector<8x128xf32>
      %22 = arith.addf %19, %21 : vector<8x128xf32>
      %c0_20 = arith.constant 0 : index
      %c0_21 = arith.constant 0 : index
      %23 = vector.load %arg6[%c0_20, %c0_21] : memref<8x128xf32, #tpu.memory_space<vmem>>, vector<8x128xf32>
      tpu.vector_store %arg6[%c0_20, %c0_21], %22 {strides = array<i32>} : memref<8x128xf32, #tpu.memory_space<vmem>>, vector<8x128xf32>,
    } else {
    }
    return
  }
  func.func @transform_0(%arg0: i32, %arg1: i32) -> (i32, i32) {
    %c0_i32 = arith.constant 0 : i32
    %c0_i32_0 = arith.constant 0 : i32
    return %arg0, %c0_i32 : i32, i32
  }
  func.func @transform_1(%arg0: i32, %arg1: i32) -> (i32, i32) {
    %c0_i32 = arith.constant 0 : i32
    %c0_i32_0 = arith.constant 0 : i32
    return %arg1, %c0_i32 : i32, i32
  }
  func.func @transform_2(%arg0: i32, %arg1: i32) -> (i32, i32) {
    %c0_i32 = arith.constant 0 : i32
    %c0_i32_0 = arith.constant 0 : i32
    return %c0_i32, %arg1 : i32, i32
  }
  func.func @transform_3(%arg0: i32, %arg1: i32) -> (i32, i32) {
    %c0_i32 = arith.constant 0 : i32
    %c0_i32_0 = arith.constant 0 : i32
    %c0_i32_1 = arith.constant 0 : i32
    return %c0_i32, %c0_i32_0 : i32, i32
  }
  func.func @transform_4(%arg0: i32, %arg1: i32) -> (i32, i32) {
    %c0_i32 = arith.constant 0 : i32
    %c0_i32_0 = arith.constant 0 : i32
    return %arg0, %c0_i32 : i32, i32
  }
  func.func @transform_5(%arg0: i32, %arg1: i32) -> (i32, i32) {
    %c0_i32 = arith.constant 0 : i32
    return %arg0, %arg1 : i32, i32
  }
}

</mosaic_0001>

<bundles_post_ra>
// kernel: tpu_custom_call.1
= control target key start
LH: loop header
LB: loop body
LE: loop exit
PB: predicated region body
PF: predicated region fallthrough
CT: control target
= control target key end

     0   :  { %11 = vsyncpa [#allocation3], 0  ;;  %s511_s0 = inlined_call_operand.hbm [shape: f32[8,128], index: 0, kind: input, shape index: {}]   ;;  %s512_s1 = inlined_call_operand.hbm [shape: f32[256,128], index: 1, kind: input, shape index: {}]   ;;  %s513_s2 = inlined_call_operand.vmem [shape: f32[1,256], index: 2, kind: input, shape index: {}]   ;;  %s514_s3 = inlined_call_operand.vmem [shape: f32[1,128], index: 3, kind: input, shape index: {}]   ;;  %s515_s4 = inlined_call_operand.hbm [shape: f32[8,128], index: 4, kind: output, shape index: {0}]   ;;  %s516_s5 = inlined_call_operand.hbm [shape: f32[8,256], index: 5, kind: output, shape index: {1}]  }
   0x1   :  { %12 = vsyncpa [#allocation6], 0 }
   0x2   :  { %13 = vsyncpa [#allocation4], 0 }
   0x3   :  { %14 = vsyncpa [#allocation9], 0  ;;  %s453_s18 = smov [#allocation2]   ;;  %s454_s20 = smov [#allocation5]  }
   0x4   :  { %s21_s19 = sshll.u32 %s453_s18, 4  ;;  %s30_s21 = sshll.u32 %s454_s20, 4  ;;  %s22_s19 = int_to_ptr.vmem [resolvable:$true] %s21_s19  ;;  %s31_s21 = int_to_ptr.vmem [resolvable:$true] %s30_s21 }
   0x5   :  { %s373_s22 = scalar_lea.vmem %s22_s19, 128  ;;  %p378_p1 = scmp.lt.s32.totalorder %s22_s19, %s22_s19 }
   0x6   :  { %p374_p0 = scmp.ne.s32.totalorder %s22_s19, %s373_s22  ;;  %p379_p2 = scmp.lt.s32.totalorder %s373_s22, %s373_s22 }
   0x8   :  { %p380_p3 = por %p379_p2, %p378_p1 }
   0xa   :  { %p381_p4 = pnand %p380_p3, %p374_p0 }
   0xc   :  { %384 = shalt.err (!%p381_p4)
}
   0xd   :  { %24 = dma.hbm_to_vmem [thread:$0]  %s511_s0, 128, %s22_s19, [#allocation3]  }
   0xe   :  { %s393_s25 = scalar_lea.vmem %s31_s21, 4096  ;;  %p398_p6 = scmp.lt.s32.totalorder %s31_s21, %s31_s21 }
   0xf   :  { %p394_p5 = scmp.ne.s32.totalorder %s31_s21, %s393_s25  ;;  %p399_p7 = scmp.lt.s32.totalorder %s393_s25, %s393_s25 }
  0x11   :  { %p400_p8 = por %p399_p7, %p398_p6 }
  0x13   :  { %p401_p9 = pnand %p400_p8, %p394_p5 }
  0x15   :  { %404 = shalt.err (!%p401_p9)
}
  0x16   :  { %s455_s26 = smov 128   ;;  %s456_s27 = smov 8  }
  0x17   :  { %36 = dma.hbm_to_vmem [thread:$0]  %s512_s1, 4096, %s31_s21, [#allocation6], %s455_s26, %s455_s26, %s456_s27  }
  0x18   :  { %445 = dma.done.wait [#allocation3], 128  }
  0x19   :  { %446 = vsyncadd [#allocation3], 4294967168 }
  0x1a   :  { %447 = dma.done.wait [#allocation6], 4096  }
  0x1b   :  { %448 = vsyncadd [#allocation6], 4294963200  ;;  %v84_v0 = vld [vmem:[#allocation5 + $0xf8] sm:$0xff]  ;;  %v83_v2 = vld [vmem:[#allocation5 + $0xf0] sm:$0xff]  ;;  %v87_v33 = vlaneseq  ;;  %s457_s30 = smov [#allocation8]  }
  0x1c   :  { %v68_v1 = vld [vmem:[#allocation5 + $0x78] sm:$0xff]  ;;  %289 = vmatprep.subr.mxu0 %v84_v0  ;;  %323 = vmatprep.subr.mxu1 %v84_v0  ;;  %v67_v3 = vld [vmem:[#allocation5 + $0x70] sm:$0xff]  ;;  %v82_v4 = vld [vmem:[#allocation5 + $0xe8] sm:$0xff]  ;;  %s274_s6 = sshll.u32 %s457_s30, 4  ;;  %s275_s6 = int_to_ptr.vmem [resolvable:$true] %s274_s6 }
  0x1d   :  { %290 = vmatpush3.xpose.msra.mxu0 %v68_v1  ;;  %324 = vmatpush3.msra.mxu1 %v68_v1  ;;  %v66_v5 = vld [vmem:[#allocation5 + $0x68] sm:$0xff]  ;;  %v81_v6 = vld [vmem:[#allocation5 + $0xe0] sm:$0xff]  ;;  %v80_v8 = vld [vmem:[#allocation5 + $0xd8] sm:$0xff]  ;;  %v88_v34 = vshrl.u32 %v87_v33, 7  ;;  %s405_s7 = scalar_lea.vmem %s275_s6, 256  ;;  %p410_p11 = scmp.lt.s32.totalorder %s275_s6, %s275_s6 }
  0x1e   :  { %291 = vmatprep.subr.mxu0 %v83_v2  ;;  %325 = vmatprep.subr.mxu1 %v83_v2  ;;  %v65_v7 = vld [vmem:[#allocation5 + $0x60] sm:$0xff]  ;;  %v64_v9 = vld [vmem:[#allocation5 + $0x58] sm:$0xff]  ;;  %v79_v11 = vld [vmem:[#allocation5 + $0xd0] sm:$0xff]  ;;  %p406_p10 = scmp.ne.s32.totalorder %s275_s6, %s405_s7  ;;  %p411_p12 = scmp.lt.s32.totalorder %s405_s7, %s405_s7 }
  0x1f   :  { %326 = vmatpush3.msra.mxu1 %v67_v3  ;;  %v495_v10 = vld [vmem:[#allocation2] sm:$0xff]  ;;  %v63_v12 = vld [vmem:[#allocation5 + $0x50] sm:$0xff]  ;;  %v78_v13 = vld [vmem:[#allocation5 + $0xc8] sm:$0xff]  ;;  %v89_v35 = vsub.s32 0, %v88_v34  ;;  %v93_v37 = vsub.s32 1, %v88_v34 }
  0x20   :  { %327 = vmatprep.subr.mxu1 %v82_v4  ;;  %321 = vmatprep.mubr.f32.mxu0 %v495_v10  ;;  %v62_v14 = vld [vmem:[#allocation5 + $0x48] sm:$0xff]  ;;  %v77_v15 = vld [vmem:[#allocation5 + $0xc0] sm:$0xff]  ;;  %v76_v17 = vld [vmem:[#allocation5 + $0xb8] sm:$0xff]  ;;  %p412_p13 = por %p411_p12, %p410_p11 }
  0x21   :  { %292 = vmatpush3.xpose.msra.mxu0 %v67_v3  ;;  %328 = vmatpush3.msra.mxu1 %v66_v5  ;;  %v61_v16 = vld [vmem:[#allocation5 + $0x40] sm:$0xff]  ;;  %v60_v18 = vld [vmem:[#allocation5 + $0x38] sm:$0xff]  ;;  %v75_v19 = vld [vmem:[#allocation5 + $0xb0] sm:$0xff] }
  0x22   :  { %293 = vmatprep.subr.mxu0 %v82_v4  ;;  %329 = vmatprep.subr.mxu1 %v81_v6  ;;  %v59_v20 = vld [vmem:[#allocation5 + $0x30] sm:$0xff]  ;;  %v74_v21 = vld [vmem:[#allocation5 + $0xa8] sm:$0xff]  ;;  %v73_v23 = vld [vmem:[#allocation5 + $0xa0] sm:$0xff]  ;;  %p413_p0 = pnand %p412_p13, %p406_p10 }
  0x23   :  { %330 = vmatpush3.msra.mxu1 %v65_v7  ;;  %v58_v22 = vld [vmem:[#allocation5 + $0x28] sm:$0xff]  ;;  %v57_v24 = vld [vmem:[#allocation5 + $0x20] sm:$0xff]  ;;  %v72_v25 = vld [vmem:[#allocation5 + $0x98] sm:$0xff] }
  0x24   :  { %331 = vmatprep.subr.mxu1 %v80_v8  ;;  %v56_v26 = vld [vmem:[#allocation5 + $0x18] sm:$0xff]  ;;  %v71_v27 = vld [vmem:[#allocation5 + $0x90] sm:$0xff]  ;;  %v70_v29 = vld [vmem:[#allocation5 + $0x88] sm:$0xff] }
  0x25   :  { %294 = vmatpush3.xpose.msra.mxu0 %v66_v5  ;;  %332 = vmatpush3.msra.mxu1 %v64_v9  ;;  %v55_v28 = vld [vmem:[#allocation5 + $0x10] sm:$0xff]  ;;  %v54_v30 = vld [vmem:[#allocation5 + $0x8] sm:$0xff]  ;;  %v69_v31 = vld [vmem:[#allocation5 + $0x80] sm:$0xff] }
  0x26   :  { %295 = vmatprep.subr.mxu0 %v81_v6  ;;  %333 = vmatprep.subr.mxu1 %v79_v11  ;;  %v53_v32 = vld [vmem:[#allocation5] sm:$0xff]  ;;  %v85_v36 = vld [vmem:[%s513_s2] sm:$0x3] }
  0x27   :  { %334 = vmatpush3.msra.mxu1 %v63_v12  ;;  %v90_v38 = vrot.slane %v85_v36, %v89_v35  ;;  %v94_v39 = vrot.slane %v85_v36, %v93_v37 }
  0x28   :  { %335 = vmatprep.subr.mxu1 %v78_v13 }
  0x29   :  { %296 = vmatpush3.xpose.msra.mxu0 %v65_v7  ;;  %336 = vmatpush3.msra.mxu1 %v62_v14 }
  0x2a   :  { %297 = vmatprep.subr.mxu0 %v80_v8  ;;  %337 = vmatprep.subr.mxu1 %v77_v15 }
  0x2b   :  { %338 = vmatpush3.msra.mxu1 %v61_v16 }
  0x2c   :  { %339 = vmatprep.subr.mxu1 %v76_v17 }
  0x2d   :  { %298 = vmatpush3.xpose.msra.mxu0 %v64_v9  ;;  %340 = vmatpush3.msra.mxu1 %v60_v18 }
  0x2e   :  { %299 = vmatprep.subr.mxu0 %v79_v11  ;;  %341 = vmatprep.subr.mxu1 %v75_v19 }
  0x2f   :  { %342 = vmatpush3.msra.mxu1 %v59_v20 }
  0x30   :  { %343 = vmatprep.subr.mxu1 %v74_v21 }
  0x31   :  { %300 = vmatpush3.xpose.msra.mxu0 %v63_v12  ;;  %344 = vmatpush3.msra.mxu1 %v58_v22 }
  0x32   :  { %301 = vmatprep.subr.mxu0 %v78_v13  ;;  %345 = vmatprep.subr.mxu1 %v73_v23 }
  0x33   :  { %346 = vmatpush3.msra.mxu1 %v57_v24 }
  0x34   :  { %347 = vmatprep.subr.mxu1 %v72_v25 }
  0x35   :  { %302 = vmatpush3.xpose.msra.mxu0 %v62_v14  ;;  %348 = vmatpush3.msra.mxu1 %v56_v26 }
  0x36   :  { %303 = vmatprep.subr.mxu0 %v77_v15  ;;  %349 = vmatprep.subr.mxu1 %v71_v27 }
  0x37   :  { %350 = vmatpush3.msra.mxu1 %v55_v28 }
  0x38   :  { %351 = vmatprep.subr.mxu1 %v70_v29 }
  0x39   :  { %304 = vmatpush3.xpose.msra.mxu0 %v61_v16  ;;  %352 = vmatpush3.msra.mxu1 %v54_v30 }
  0x3a   :  { %305 = vmatprep.subr.mxu0 %v76_v17  ;;  %353 = vmatprep.subr.mxu1 %v69_v31 }
  0x3b   :  { %354 = vmatpush3.msra.mxu1 %v53_v32 }
  0x3d   :  { %306 = vmatpush3.xpose.msra.mxu0 %v60_v18 }
  0x3e   :  { %307 = vmatprep.subr.mxu0 %v75_v19 }
  0x41   :  { %308 = vmatpush3.xpose.msra.mxu0 %v59_v20 }
  0x42   :  { %309 = vmatprep.subr.mxu0 %v74_v21 }
  0x45   :  { %310 = vmatpush3.xpose.msra.mxu0 %v58_v22 }
  0x46   :  { %311 = vmatprep.subr.mxu0 %v73_v23 }
  0x49   :  { %312 = vmatpush3.xpose.msra.mxu0 %v57_v24 }
  0x4a   :  { %313 = vmatprep.subr.mxu0 %v72_v25 }
  0x4d   :  { %314 = vmatpush3.xpose.msra.mxu0 %v56_v26 }
  0x4e   :  { %315 = vmatprep.subr.mxu0 %v71_v27 }
  0x51   :  { %316 = vmatpush3.xpose.msra.mxu0 %v55_v28 }
  0x52   :  { %317 = vmatprep.subr.mxu0 %v70_v29 }
  0x55   :  { %318 = vmatpush3.xpose.msra.mxu0 %v54_v30 }
  0x56   :  { %319 = vmatprep.subr.mxu0 %v69_v31 }
  0x59   :  { %320 = vmatpush3.xpose.msra.mxu0 %v53_v32 }
  0x5c   :  { %322 = vmatmul.mubr.f32.vlgmr.msra.gmra.mxu0 %v495_v10 }
 0x11c   :  { %v163_v40 = vpop.f32.mrf.mxu0 }
 0x11d   :  { %v164_v41 = vadd.f32 %v163_v40, %v90_v38 }
 0x11e   :  { %v165_v42 = vpop.f32.mrf.mxu0 }
 0x11f   :  { %v168_v43 = vmax.f32 %v164_v41, 0.0  ;;  %v166_v44 = vadd.f32 %v165_v42, %v94_v39 }
 0x121   :  { %170 = vst [vmem:[#allocation8] sm:$0xff] %v168_v43  ;;  %v169_v45 = vmax.f32 %v166_v44, 0.0 }
 0x123   :  { %171 = vst [vmem:[#allocation8 + $0x8] sm:$0xff] %v169_v45  ;;  %237 = vmatprep.mubr.f32.mxu1 %v169_v45 }
 0x124   :  { %238 = vmatmul.mubr.f32.vlgmr.msra.gmra.mxu1 %v168_v43 }
 0x125   :  { %416 = shalt.err (!%p413_p0)
}
 0x126   :  { %277 = dma.vmem_to_hbm [thread:$0]  %s275_s6, 256, %s516_s5, [#allocation9]   ;;  %v288_v49 = vld [vmem:[%s514_s3] ss:$0 sm:$0xff] }
 0x127   :  { %s458_s11 = smov [#allocation7]  }
 0x128   :  { %s264_s12 = sshll.u32 %s458_s11, 4  ;;  %s265_s12 = int_to_ptr.vmem [resolvable:$true] %s264_s12 }
 0x129   :  { %s425_s13 = scalar_lea.vmem %s265_s12, 128  ;;  %p430_p2 = scmp.lt.s32.totalorder %s265_s12, %s265_s12 }
 0x12a   :  { %p426_p1 = scmp.ne.s32.totalorder %s265_s12, %s425_s13  ;;  %p431_p3 = scmp.lt.s32.totalorder %s425_s13, %s425_s13 }
 0x12c   :  { %p432_p4 = por %p431_p3, %p430_p2 }
 0x12e   :  { %p433_p5 = pnand %p432_p4, %p426_p1 }
 0x1e4   :  { %v355_v46 = vpop.f32.mrf.mxu1 }
 0x1e6   :  { %v356_v47 = vpop.f32.mrf.mxu1 }
 0x1e7   :  { %v357_v48 = vadd.f32 %v356_v47, %v355_v46 }
 0x1e9   :  { %v256_v50 = vadd.f32 %v357_v48, %v288_v49 }
 0x1eb   :  { %257 = vst [vmem:[#allocation7] sm:$0xff] %v256_v50 }
 0x1ec   :  { %436 = shalt.err (!%p433_p5)
}
 0x1ed   :  { %267 = dma.vmem_to_hbm [thread:$0]  %s265_s12, 128, %s515_s4, [#allocation4]  }
 0x1ee   :  { %449 = dma.done.wait [#allocation4], 128  }
 0x1ef   :  { %450 = vsyncadd [#allocation4], 4294967168 }
 0x1f0   :  { %451 = dma.done.wait [#allocation9], 256  }
 0x1f1   :  { %452 = vsyncadd [#allocation9], 4294967040 }
 0x1f2   :  { %284 = vsyncpa [#allocation3], 1 }
 0x1f3   :  { %285 = vsyncpa [#allocation6], 1 }
 0x1f4   :  { %286 = vsyncpa [#allocation4], 1 }
 0x1f5   :  { %287 = vsyncpa [#allocation9], 1 }

</bundles_post_ra>
